<compile_context>
chip_gen: v6e
topology: v6e:2x2x1
jax: 0.10.0
libtpu: 0.0.40
codegen_flags: <defaults>
</compile_context>

<pallas_src>
import jax
import jax.numpy as jnp
from jax import lax
from jax.experimental import pallas as pl
from jax.experimental.pallas import tpu as pltpu


# ----------------------------- Pallas kernel -------------------------------

def _rgb_head_kernel(x_ref, w_ref, b_ref, o_ref):
    """1x1 conv as a channel matmul on one (batch, spatial-tile) block.

    x_ref: (1, Cin, THW)   input pixels, channels on sublanes, pixels on lanes
    w_ref: (Cout, Cin)     1x1 conv weight (resident across the grid)
    b_ref: (Cout, 1)       conv bias       (resident across the grid)
    o_ref: (1, Cout, THW)  output pixels
    """
    x = x_ref[0]                                              # (Cin, THW)
    y = jnp.dot(w_ref[...], x,
                preferred_element_type=jnp.float32,
                precision=lax.Precision.HIGHEST)              # (Cout, THW) on MXU
    o_ref[0] = y + b_ref[...]                                 # bias broadcast


# --------------------------- tile-size selection ----------------------------

# Budget for the pipelined data blocks (input + output, each double-buffered).
# 12 MiB is comfortably under the default scoped-VMEM limit on every
# generation (16 MiB v5e, 32 MiB v6e, 32-of-64 MiB v7x).
_DATA_VMEM_BUDGET_BYTES = 12 * 1024 * 1024
_MAX_HW_TILE = 4096          # beyond this the kernel is already at the HBM roofline
_VMEM_LIMIT_BYTES = 32 * 1024 * 1024


def _choose_tiling(N, Cin, Cout, HW):
    """Return (hw_tile, num_tiles, HW_padded) for the flattened spatial axis."""
    # Pad the pixel axis up to a lane multiple first.
    hw_pad128 = ((HW + 127) // 128) * 128

    # Double-buffered f32 footprint per pixel of tile: input (Cin) + output (Cout).
    bytes_per_pixel = 2 * (Cin + Cout) * 4
    max_tile = (_DATA_VMEM_BUDGET_BYTES // bytes_per_pixel) // 128 * 128
    max_tile = max(128, min(_MAX_HW_TILE, max_tile))

    num_tiles = max(1, -(-hw_pad128 // max_tile))             # ceil div
    # Guarantee >= 2 total parallel grid steps so both v7x TensorCores get work.
    if N * num_tiles < 2 and hw_pad128 >= 256:
        num_tiles = 2

    hw_tile = -(-hw_pad128 // num_tiles)                      # ceil div
    hw_tile = ((hw_tile + 127) // 128) * 128                  # lane multiple, <= max_tile
    hw_padded = hw_tile * num_tiles
    return hw_tile, num_tiles, hw_padded


# ------------------------------- wrapper ------------------------------------

def rgb_head_pallas(x_nchw, weight, bias, *, downsample_factor):
    """Forward pass of RGBHead.

    x_nchw: (N, Cin, H, W) float32  (PyTorch NCHW layout, kept as-is)
    weight: (Cout, Cin, 1, 1)       nn.Conv2d weight
    bias:   (Cout,)                 nn.Conv2d bias
    Returns {'rgb_<downsample_factor>': (N, Cout, H, W)}.
    """
    N, Cin, H, W = x_nchw.shape
    Cout = weight.shape[0]
    HW = H * W

    hw_tile, num_tiles, hw_padded = _choose_tiling(N, Cin, Cout, HW)

    x_flat = x_nchw.reshape(N, Cin, HW)                       # free reshape
    if hw_padded != HW:
        # Pad the pixel axis so the tile divides it exactly (cheap, sliced off below).
        x_flat = jnp.pad(x_flat, ((0, 0), (0, 0), (0, hw_padded - HW)))
    w2d = weight.reshape(Cout, Cin)
    b2d = bias.reshape(Cout, 1)

    out_flat = pl.pallas_call(
        _rgb_head_kernel,
        out_shape=jax.ShapeDtypeStruct((N, Cout, hw_padded), jnp.float32),
        grid=(N, num_tiles),
        in_specs=[
            pl.BlockSpec((1, Cin, hw_tile), lambda n, t: (n, 0, t)),
            pl.BlockSpec((Cout, Cin), lambda n, t: (0, 0)),
            pl.BlockSpec((Cout, 1), lambda n, t: (0, 0)),
        ],
        out_specs=pl.BlockSpec((1, Cout, hw_tile), lambda n, t: (n, 0, t)),
        compiler_params=pltpu.CompilerParams(
            dimension_semantics=("parallel", "parallel"),
            vmem_limit_bytes=_VMEM_LIMIT_BYTES),
    )(x_flat, w2d, b2d)

    if hw_padded != HW:
        out_flat = out_flat[:, :, :HW]
    out = out_flat.reshape(N, Cout, H, W)
    return {f'rgb_{downsample_factor}': out}


# ------------------------- pure-JAX reference -------------------------------

def ref_rgb_head(x_nchw, weight, bias):
    Cout, Cin = weight.shape[0], weight.shape[1]
    w2d = weight.reshape(Cout, Cin)
    y = jnp.einsum('oi,nihw->nohw', w2d, x_nchw,
                   precision=lax.Precision.HIGHEST)
    return y + bias[None, :, None, None]


# --------------------------------- main --------------------------------------

if __name__ == "__main__":
    key = jax.random.PRNGKey(0)
    kx, kw, kb = jax.random.split(key, 3)

    # Small shapes consistent with RGBHead: batch=2, in_channels=32,
    # n_classes=3 (RGB), spatial 16x16, downsample_factor=4.
    N, Cin, H, W = 2, 32, 16, 16
    Cout = 3
    downsample_factor = 4

    x = jax.random.normal(kx, (N, Cin, H, W), jnp.float32)
    weight = jax.random.normal(kw, (Cout, Cin, 1, 1), jnp.float32) * (1.0 / Cin) ** 0.5
    bias = 0.1 * jax.random.normal(kb, (Cout,), jnp.float32)

    out_dict = rgb_head_pallas(x, weight, bias, downsample_factor=downsample_factor)
    out = jax.block_until_ready(out_dict[f'rgb_{downsample_factor}'])

    assert set(out_dict.keys()) == {f'rgb_{downsample_factor}'}
    assert out.shape == (N, Cout, H, W), out.shape

    ref = ref_rgb_head(x, weight, bias)
    err = float(jnp.max(jnp.abs(out - ref)))
    assert err < 1e-4, f"mismatch vs reference: max abs err = {err}"

    print("KERNEL_OK")
</pallas_src>

<mosaic_0001>
module attributes {stable_mosaic.version = 11 : i64} {
  func.func @_rgb_head_kernel(%arg0: i32, %arg1: i32, %arg2: memref<1x32x256xf32, #tpu.memory_space<vmem>>, %arg3: memref<3x32xf32, #tpu.memory_space<vmem>>, %arg4: memref<3x1xf32, #tpu.memory_space<vmem>>, %arg5: memref<1x3x256xf32, #tpu.memory_space<vmem>>) attributes {dimension_semantics = [#tpu.dimension_semantics<parallel>, #tpu.dimension_semantics<parallel>], iteration_bounds = array<i64: 2, 1>, scalar_prefetch = 0 : i64, scratch_operands = 0 : i64, tpu.core_type = #tpu.core_type<tc>, window_params = [{transform_indices = @transform_0, window_bounds = array<i64: 1, 32, 256>}, {pipeline_mode = #tpu.pipeline_mode<synchronous>, transform_indices = @transform_1, window_bounds = array<i64: 3, 32>}, {pipeline_mode = #tpu.pipeline_mode<synchronous>, transform_indices = @transform_2, window_bounds = array<i64: 3, 1>}, {transform_indices = @transform_3, window_bounds = array<i64: 1, 3, 256>}]} {
    %c0 = arith.constant 0 : index
    %c0_0 = arith.constant 0 : index
    %c0_1 = arith.constant 0 : index
    %0 = vector.load %arg2[%c0, %c0_0, %c0_1] : memref<1x32x256xf32, #tpu.memory_space<vmem>>, vector<1x32x256xf32>
    %1 = vector.shape_cast %0 : vector<1x32x256xf32> to vector<32x256xf32>
    %c0_2 = arith.constant 0 : index
    %c0_3 = arith.constant 0 : index
    %2 = vector.load %arg3[%c0_2, %c0_3] : memref<3x32xf32, #tpu.memory_space<vmem>>, vector<3x32xf32>
    %cst = arith.constant dense<0.000000e+00> : vector<3x256xf32>
    %3 = tpu.matmul %2, %1, %cst {dimension_numbers = #tpu.dot_dimension_numbers<[1], [0], [0], [1], [0, 0, 1, 1], [], []>, precision = #tpu.contract_precision<fp32>} : vector<3x32xf32>, vector<32x256xf32>, vector<3x256xf32> -> vector<3x256xf32>
    %c0_4 = arith.constant 0 : index
    %c0_5 = arith.constant 0 : index
    %4 = vector.load %arg4[%c0_4, %c0_5] : memref<3x1xf32, #tpu.memory_space<vmem>>, vector<3x1xf32>
    %5 = vector.broadcast %4 : vector<3x1xf32> to vector<3x256xf32>
    %6 = arith.addf %3, %5 : vector<3x256xf32>
    %c0_6 = arith.constant 0 : index
    %c0_7 = arith.constant 0 : index
    %c0_8 = arith.constant 0 : index
    %7 = vector.load %arg5[%c0_6, %c0_7, %c0_8] : memref<1x3x256xf32, #tpu.memory_space<vmem>>, vector<1x3x256xf32>
    %8 = vector.shape_cast %7 : vector<1x3x256xf32> to vector<3x256xf32>
    %9 = vector.shape_cast %6 : vector<3x256xf32> to vector<1x3x256xf32>
    tpu.vector_store %arg5[%c0_6, %c0_7, %c0_8], %9 {strides = array<i32>} : memref<1x3x256xf32, #tpu.memory_space<vmem>>, vector<1x3x256xf32>,
    return
  }
  func.func @transform_0(%arg0: i32, %arg1: i32) -> (i32, i32, i32) {
    %c0_i32 = arith.constant 0 : i32
    %c0_i32_0 = arith.constant 0 : i32
    return %arg0, %c0_i32, %arg1 : i32, i32, i32
  }
  func.func @transform_1(%arg0: i32, %arg1: i32) -> (i32, i32) {
    %c0_i32 = arith.constant 0 : i32
    %c0_i32_0 = arith.constant 0 : i32
    %c0_i32_1 = arith.constant 0 : i32
    return %c0_i32, %c0_i32_0 : i32, i32
  }
  func.func @transform_2(%arg0: i32, %arg1: i32) -> (i32, i32) {
    %c0_i32 = arith.constant 0 : i32
    %c0_i32_0 = arith.constant 0 : i32
    %c0_i32_1 = arith.constant 0 : i32
    return %c0_i32, %c0_i32_0 : i32, i32
  }
  func.func @transform_3(%arg0: i32, %arg1: i32) -> (i32, i32, i32) {
    %c0_i32 = arith.constant 0 : i32
    %c0_i32_0 = arith.constant 0 : i32
    return %arg0, %c0_i32, %arg1 : i32, i32, i32
  }
}

</mosaic_0001>

<bundles_post_ra>
// kernel: tpu_custom_call.1
= control target key start
LH: loop header
LB: loop body
LE: loop exit
PB: predicated region body
PF: predicated region fallthrough
CT: control target
= control target key end

     0   :  { %8 = vsyncpa [#allocation3], 0  ;;  %s1259_s0 = inlined_call_operand.hbm [shape: f32[2,32,256], index: 0, kind: input, shape index: {}]   ;;  %s1260_s1 = inlined_call_operand.vmem [shape: f32[3,32], index: 1, kind: input, shape index: {}]   ;;  %s1261_s2 = inlined_call_operand.vmem [shape: f32[3,1], index: 2, kind: input, shape index: {}]   ;;  %s1262_s3 = inlined_call_operand.vmem [shape: f32[2,3,256], index: 3, kind: output, shape index: {}]  }
   0x1   :  { %10 = vsyncpa [#allocation3 + $0x1], 0  ;;  %s1061_s12 = smov 0   ;;  %s1063_s13 = smov 0  }
   0x2   :  { %s1065_s14 = smov 0   ;;  %s1067_s15 = smov 0  }
   0x3   :  { %s1069_s16 = smov 0   ;;  %s1071_s17 = smov 0  }
   0x4 LB: > { %s881_s18 = sadd.s32 4294967295, %s1034_s17   ;;  %s28_s19 = sadd.s32 1, %s1030_s16  ;;  %s1034_s17 = sphi %s1071_s17, %s16_s17   ;;  %s1030_s16 = sphi %s1069_s16, %s1270_s16   ;;  %s1026_s15 = sphi %s1067_s15, %s1269_s15   ;;  %s1022_s14 = sphi %s1065_s14, %s1268_s14   ;;  %s1018_s13 = sphi %s1063_s13, %s1267_s13   ;;  %s1014_s12 = sphi %s1061_s12, %s1266_s12  }
   0x5   : > { %p30_p0 = scmp.ge.s32.totalorder %s28_s19, 2  ;;  %s37_s20 = sadd.s32 1, %s1022_s14 }
   0x6   : > { %p44_p1 = scmp.ne.s32.totalorder %s1022_s14, %s1018_s13  ;;  %p45_p2 = scmp.eq.s32.totalorder %s1034_s17, 0 }
   0x7   : > { %s1272_s19 = smov (%p30_p0, %s28_s19), 0  ;;  %p50_p4 = scmp.ne.s32.totalorder %s1018_s13, %s1014_s12 }
   0x8   : > { %p1097_p3 = por %p45_p2, %p44_p1  ;;  %s32_s22 = ssub.s32 %s1030_s16, %s1272_s19 }
   0x9   : > { %p51_p5 = scmp.eq.s32.totalorder %s881_s18, 0  ;;  %p35_p6 = scmp.eq.s32.totalorder %s32_s22, 0 }
   0xa   : > { %p902_p8 = scmp.lt.s32.totalorder %s1034_s17, 2  ;;  %s150_s25 = sand.u32 1, %s1022_s14  }
   0xb   : > { %p1104_p7 = por %p51_p5, %p50_p4  ;;  %s894_s26 = sshll.u32 %s1030_s16, 10 }
   0xc   : > { %s1110_s24 = scalar_select %p35_p6, %s1022_s14, %s37_s20  }
   0xd   : > { %s885_s27 = sshll.u32 %s150_s25, 6  ;;  %s162_s30 = scalar_lea.hbm %s1259_s0, %s894_s26 }
   0xe   : > { %s154_s4 = scalar_lea.vmem [#allocation2], %s885_s27  ;;  %p1119_p9 = pnand %p902_p8, %p1097_p3 }
   0xf   : > { %s163_s5 = sshll.u32 %s154_s4, 4  ;;  %s151_s7 = scalar_lea.sflag [#allocation3], %s150_s25  ;;  %s164_s5 = int_to_ptr.vmem [resolvable:$true] %s163_s5 }
  0x10   : > { %p958_p10 = pneg %p1119_p9  ;;  %s969_s8 = scalar_lea.vmem %s164_s5, 1024 }
  0x11   : > { %p970_p11 = scmp.ne.s32.totalorder %s164_s5, %s969_s8  ;;  %s1036_s9 = smov [#allocation2]  }
  0x12   : > { %s974_s10 = sshll.u32 %s1036_s9, 4  ;;  %s975_s10 = int_to_ptr.vmem [resolvable:$false] %s974_s10 }
  0x13   : > { %p972_p12 = pnand %p970_p11, %p958_p10  ;;  %s976_s11 = scalar_lea.vmem %s975_s10, 2048 }
  0x14   : > { %p977_p0 = scmp.lt.s32.totalorder %s164_s5, %s975_s10  ;;  %p978_p1 = scmp.lt.s32.totalorder %s976_s11, %s969_s8 }
  0x15   : > { %p973_p13 = pneg %p972_p12 }
  0x16   : > { %p979_p2 = por %p978_p1, %p977_p0 }
  0x18   : > { %p980_p3 = pnand %p979_p2, %p973_p13 }
  0x1a   : > { %983 = shalt.err (!%p980_p3)
}
  0x1b   : > { %s1037_s12 = smov 256   ;;  %s1038_s18 = smov 16  }
  0x1c   : > { %901 = dma.hbm_to_vmem [thread:$0]  (!%p1119_p9), %s162_s30, 1024, %s164_s5, %s151_s7, %s1037_s12, %s1037_s12, %s1038_s18  }
  0x1d   : > { %p888_p4 = scmp.ge.s32.totalorder %s1034_s17, 1  ;;  %p171_p5 = scmp.lt.s32.totalorder %s1034_s17, 3 }
  0x1f   : > { %p172_p6 = pnand %p888_p4, %p171_p5 }
  0x20   : > { %s177_s20 = sand.u32 (!%p172_p6), 1, %s1018_s13  }
  0x21   : > { %175 = sbr.rel (%p172_p6) target bundleno = 278 (0x116), region = 32  ;;  %s889_s21 = sshll.u32 (!%p172_p6), %s177_s20, 6 }
  0x22   : > { %s178_s22 = scalar_lea.sflag (!%p172_p6), [#allocation3], %s177_s20  ;;  %s181_s25 = scalar_lea.vmem (!%p172_p6), [#allocation2], %s889_s21 }
  0x26   : > { %1009 = dma.done.wait (%p1104_p7), %s178_s22, 1024  }
  0x27   : > { %1011 = vsyncadd (%p1104_p7), %s178_s22, 4294966272  ;;  %v1039_v0 = vmov 0.0   ;;  %v1040_v1 = vmov 0   ;;  %v226_v2 = vld [vmem:[%s181_s25 + $0x38] sm:$0xff]  ;;  %v225_v3 = vld [vmem:[%s181_s25 + $0x30] sm:$0xff]  ;;  %vm234_vm0 = vcmask 261120  }
  0x28   : > { %310 = vmatprep.mubr.f32.mxu0 %v1039_v0  ;;  %426 = vmatprep.mubr.f32.mxu1 %v1039_v0  ;;  %v224_v4 = vld [vmem:[%s181_s25 + $0x28] sm:$0xff]  ;;  %v1136_v5 = vand.u32 4294901760, %v226_v2  ;;  %v1138_v6 = vand.u32 4294901760, %v225_v3  ;;  %v223_v8 = vld [vmem:[%s181_s25 + $0x20] sm:$0xff]  ;;  %v222_v9 = vld [vmem:[%s181_s25 + $0x18] sm:$0xff]  ;;  %p210_p7 = scmp.lt.s32.totalorder %s1026_s15, 1 }
  0x29   : > { %955 = vset.pattern.permute.xlu0 %v1040_v1  ;;  %v1140_v7 = vand.u32 4294901760, %v224_v4  ;;  %v221_v10 = vld [vmem:[%s181_s25 + $0x10] sm:$0xff]  ;;  %v1142_v11 = vand.u32 4294901760, %v223_v8  ;;  %v1144_v12 = vand.u32 4294901760, %v222_v9  ;;  %v220_v14 = vld [vmem:[%s181_s25 + $0x8] sm:$0xff]  ;;  %v219_v15 = vld [vmem:[%s181_s25] sm:$0xff] }
  0x2a   : > { %v1146_v13 = vand.u32 4294901760, %v221_v10  ;;  %263 = vmatprep.subr.mxu0 %v1136_v5  ;;  %v1149_v16 = vand.u32 4294901760, %v220_v14  ;;  %v1152_v17 = vsub.f32 %v226_v2, %v1136_v5  ;;  %v1154_v18 = vand.u32 4294901760, %v219_v15  ;;  %v227_v20 = vld [vmem:[%s1260_s1] sm:$0x7]  ;;  %s1274_s15 = smov (!%p210_p7, %s1026_s15), 1 }
  0x2b   : > { %v1157_v19 = vsub.f32 %v225_v3, %v1138_v6  ;;  %v228_v21 = vld [vmem:[%s1261_s2] sm:$0x7]  ;;  %265 = vmatpush1.msra.mxu0 %v1138_v6  ;;  %v1167_v22 = vsub.f32 %v224_v4, %v1140_v7  ;;  %v236_v23 = vsel %vm234_vm0, %v227_v20, 0  ;;  %v1171_v24 = vsub.f32 %v223_v8, %v1142_v11  ;;  %s895_s29 = sshll.u32 %s1274_s15, 3 }
  0x2c   : > { %v1174_v25 = vsub.f32 %v222_v9, %v1144_v12  ;;  %231 = vperm.xlu0 %955, %v228_v21   ;;  %267 = vmatprep.subr.mxu0 %v1140_v7  ;;  %v348_v26 = vand.u32 4294901760, %v1152_v17  ;;  %v1179_v28 = vand.u32 4294901760, %v236_v23  ;;  %v1182_v29 = vsub.f32 %v221_v10, %v1146_v13  ;;  %s217_s5 = scalar_lea.vmem %s1262_s3, %s895_s29 }
  0x2d   : > { %v354_v27 = vand.u32 4294901760, %v1157_v19  ;;  %269 = vmatpush1.msra.mxu0 %v1142_v11  ;;  %v360_v30 = vand.u32 4294901760, %v1167_v22  ;;  %v366_v31 = vand.u32 4294901760, %v1171_v24  ;;  %v1189_v33 = vsub.f32 %v220_v14, %v1149_v16 }
  0x2e   : > { %v372_v32 = vand.u32 4294901760, %v1174_v25  ;;  %271 = vmatprep.subr.mxu0 %v1144_v12  ;;  %v349_v34 = vsub.f32 %v1152_v17, %v348_v26  ;;  %v312_v36 = vsub.f32 %v236_v23, %v1179_v28  ;;  %v378_v37 = vand.u32 4294901760, %v1182_v29 }
  0x2f   : > { %v355_v35 = vsub.f32 %v1157_v19, %v354_v27  ;;  %273 = vmatpush1.msra.mxu0 %v1146_v13  ;;  %v361_v38 = vsub.f32 %v1167_v22, %v360_v30  ;;  %v367_v39 = vsub.f32 %v1171_v24, %v366_v31  ;;  %v384_v41 = vand.u32 4294901760, %v1189_v33 }
  0x30   : > { %v373_v40 = vsub.f32 %v1174_v25, %v372_v32  ;;  %275 = vmatprep.subr.mxu0 %v1149_v16  ;;  %v350_v42 = vand.u32 4294901760, %v349_v34  ;;  %v313_v44 = vand.u32 4294901760, %v312_v36  ;;  %v379_v45 = vsub.f32 %v1182_v29, %v378_v37 }
  0x31   : > { %v356_v43 = vand.u32 4294901760, %v355_v35  ;;  %277 = vmatpush1.msra.mxu0 %v1154_v18  ;;  %v362_v46 = vand.u32 4294901760, %v361_v38  ;;  %v368_v47 = vand.u32 4294901760, %v367_v39  ;;  %v385_v48 = vsub.f32 %v1189_v33, %v384_v41 }
  0x32   : > { %351 = vmatprep.subr.mxu1 %v350_v42  ;;  %460 = vmatprep.subr.mxu0 %v1152_v17  ;;  %v314_v49 = vsub.f32 %v312_v36, %v313_v44  ;;  %v374_v50 = vand.u32 4294901760, %v373_v40  ;;  %v389_v51 = vsub.f32 %v219_v15, %v1154_v18  ;;  %v380_v52 = vand.u32 4294901760, %v379_v45 }
  0x33   : > { %357 = vmatpush1.msra.mxu1 %v356_v43  ;;  %v386_v54 = vand.u32 4294901760, %v385_v48 }
  0x34   : > { %363 = vmatprep.subr.mxu1 %v362_v46  ;;  %v315_v53 = vand.u32 4294901760, %v314_v49  ;;  %v390_v55 = vand.u32 4294901760, %v389_v51 }
  0x35   : > { %369 = vmatpush1.msra.mxu1 %v368_v47 }
  0x36   : > { %316 = vmatmul.mubr.f32.vlgmr.msra.gmra.mxu0 %v315_v53  ;;  %375 = vmatprep.subr.mxu1 %v374_v50  ;;  %v391_v56 = vsub.f32 %v389_v51, %v390_v55 }
  0x37   : > { %463 = vmatpush1.msra.mxu0 %v1157_v19  ;;  %381 = vmatpush1.msra.mxu1 %v380_v52 }
  0x38   : > { %466 = vmatprep.subr.mxu0 %v1167_v22  ;;  %387 = vmatprep.subr.mxu1 %v386_v54  ;;  %v392_v57 = vand.u32 4294901760, %v391_v56 }
  0x39   : > { %469 = vmatpush1.msra.mxu0 %v1171_v24  ;;  %514 = vmatprep.mubr.f32.mxu0 %v1039_v0 }
  0x3a   : > { %472 = vmatprep.subr.mxu0 %v1174_v25  ;;  %393 = vmatpush1.msra.mxu1 %v392_v57 }
  0x3b   : > { %475 = vmatpush1.msra.mxu0 %v1182_v29  ;;  %428 = vmatmul.mubr.f32.vlgmr.msra.gmra.mxu1 %v1179_v28 }
  0x3c   : > { %478 = vmatprep.subr.mxu0 %v1189_v33  ;;  %548 = vmatprep.subr.mxu1 %v1136_v5 }
  0x3d   : > { %481 = vmatpush1.msra.mxu0 %v389_v51  ;;  %550 = vmatpush1.msra.mxu1 %v1138_v6 }
  0x3e   : > { %517 = vmatmul.mubr.f32.vlgmr.msra.gmra.mxu0 %v312_v36  ;;  %552 = vmatprep.subr.mxu1 %v1140_v7 }
  0x3f   : > { %632 = vmatprep.subr.mxu0 %v348_v26  ;;  %554 = vmatpush1.msra.mxu1 %v1142_v11 }
  0x40   : > { %636 = vmatpush1.msra.mxu0 %v354_v27  ;;  %556 = vmatprep.subr.mxu1 %v1144_v12 }
  0x41   : > { %640 = vmatprep.subr.mxu0 %v360_v30  ;;  %558 = vmatpush1.msra.mxu1 %v1146_v13 }
  0x42   : > { %644 = vmatpush1.msra.mxu0 %v366_v31  ;;  %560 = vmatprep.subr.mxu1 %v1149_v16 }
  0x43   : > { %648 = vmatprep.subr.mxu0 %v372_v32  ;;  %562 = vmatpush1.msra.mxu1 %v1154_v18 }
  0x44   : > { %595 = vmatprep.mubr.f32.mxu1 %v1039_v0  ;;  %652 = vmatpush1.msra.mxu0 %v378_v37 }
  0x45   : > { %599 = vmatmul.mubr.f32.vlgmr.msra.gmra.mxu1 %v313_v44  ;;  %656 = vmatprep.subr.mxu0 %v384_v41 }
  0x46   : > { %726 = vmatprep.subr.mxu1 %v1136_v5  ;;  %660 = vmatpush1.msra.mxu0 %v390_v55 }
  0x47   : > { %693 = vmatprep.mubr.f32.mxu0 %v1039_v0  ;;  %728 = vmatpush1.msra.mxu1 %v1138_v6 }
  0x48   : > { %695 = vmatmul.mubr.f32.vlgmr.msra.gmra.mxu0 %v1179_v28  ;;  %730 = vmatprep.subr.mxu1 %v1140_v7 }
  0x49   : > { %732 = vmatpush1.msra.mxu1 %v1142_v11  ;;  %773 = vmatprep.mubr.f32.mxu1 %v1039_v0 }
  0x4a   : > { %734 = vmatprep.subr.mxu1 %v1144_v12 }
  0x4b   : > { %736 = vmatpush1.msra.mxu1 %v1146_v13 }
  0x4c   : > { %738 = vmatprep.subr.mxu1 %v1149_v16 }
  0x4d   : > { %740 = vmatpush1.msra.mxu1 %v1154_v18 }
  0x4e   : > { %775 = vmatmul.mubr.f32.vlgmr.msra.gmra.mxu1 %v1179_v28 }
  0xa7   : > { %v232_v59 = vpop.permute.xlu0 %231 }
  0xf6   : > { %v317_v58 = vpop.f32.mrf.mxu0 }
  0xf7   : > { %v318_v62 = vadd.f32 %v317_v58, %v232_v59 }
  0xf8   : > { %v319_v60 = vpop.f32.mrf.mxu0 }
  0xf9   : > { %v320_v63 = vadd.f32 %v319_v60, %v232_v59 }
  0xfb   : > { %v429_v61 = vpop.f32.mrf.mxu1 }
  0xfc   : > { %v430_v2 = vadd.f32 %v429_v61, %v318_v62 }
  0xfd   : > { %v431_v1 = vpop.f32.mrf.mxu1 }
  0xfe   : > { %v518_v0 = vpop.f32.mrf.mxu0  ;;  %v432_v3 = vadd.f32 %v431_v1, %v320_v63 }
  0xff   : > { %v519_v8 = vadd.f32 %v518_v0, %v430_v2 }
 0x100   : > { %v520_v5 = vpop.f32.mrf.mxu0 }
 0x101   : > { %v521_v9 = vadd.f32 %v520_v5, %v432_v3 }
 0x105   : > { %v600_v4 = vpop.f32.mrf.mxu1 }
 0x106   : > { %v601_v10 = vadd.f32 %v600_v4, %v519_v8 }
 0x107   : > { %v602_v6 = vpop.f32.mrf.mxu1 }
 0x108   : > { %v696_v7 = vpop.f32.mrf.mxu0  ;;  %v603_v11 = vadd.f32 %v602_v6, %v521_v9 }
 0x109   : > { %v697_v14 = vadd.f32 %v696_v7, %v601_v10 }
 0x10a   : > { %v698_v12 = vpop.f32.mrf.mxu0 }
 0x10b   : > { %v699_v15 = vadd.f32 %v698_v12, %v603_v11 }
 0x10e   : > { %v776_v13 = vpop.f32.mrf.mxu1 }
 0x10f   : > { %v777_v17 = vadd.f32 %v776_v13, %v697_v14 }
 0x110   : > { %v778_v16 = vpop.f32.mrf.mxu1 }
 0x111   : > { %v779_v18 = vadd.f32 %v778_v16, %v699_v15 }
 0x113   : > { %v783_v19 = vcombine.low %v777_v17, %v779_v18 }
 0x115   : > { %785 = vst [vmem:[%s217_s5] sm:$0x77] %v783_v19 }
 0x116 PF: > { %s16_s17 = sadd.s32 1, %s1034_s17   ;;  %s1266_s12 = smov %s1018_s13 }
 0x117   : > { %p13_p8 = scmp.ge.s32.totalorder %s16_s17, 4   ;;  %s1267_s13 = smov %s1022_s14 }
 0x118   : > { %s1268_s14 = smov %s1110_s24  ;;  %s1269_s15 = smov %s1030_s16 }
 0x119   : > { %s1270_s16 = smov %s1272_s19  ;;  %15 = sbr.rel (!%p13_p8) target bundleno = 4 (0x4), region = 72 }
 0x11e   :  { %816 = vsyncpa [#allocation3], 1 }
 0x11f   :  { %818 = vsyncpa [#allocation3 + $0x1], 1 }

</bundles_post_ra>
